<compile_context>
chip_gen: v6e
topology: v6e:2x2x1
jax: 0.10.0
libtpu: 0.0.40
codegen_flags: <defaults>
</compile_context>

<pallas_src>
import jax
import jax.numpy as jnp
from jax.experimental import pallas as pl
from jax.experimental.pallas import tpu as pltpu


def _round_up(a: int, b: int) -> int:
    return (a + b - 1) // b * b


def _next_action_kernel(xT_ref, w_ref, b_ref, o_ref):
    # xT_ref : (hidden, tm)           current row tile; rows on the lane axis
    # w_ref  : (actionspace, hidden)  full weight (PyTorch layout), resident
    # b_ref  : (actionspace, 1)       bias
    # o_ref  : (actionspace, tm)      log-probabilities (lane-dense)
    logits = jnp.dot(w_ref[...], xT_ref[...],          # native-dtype MXU pass
                     preferred_element_type=jnp.float32)
    logits = logits + b_ref[...].astype(jnp.float32)

    # numerically-stable log-softmax along the actionspace (sublane) axis
    m = jnp.max(logits, axis=0, keepdims=True)
    z = logits - m
    lse = jnp.log(jnp.sum(jnp.exp(z), axis=0, keepdims=True))
    o_ref[...] = (z - lse).astype(o_ref.dtype)


def next_action_prediction(x, weight, bias, *, tm=None):
    """x: (..., hidden); weight: (actionspace, hidden) [PyTorch layout]; bias: (actionspace,).

    Returns log-probabilities of shape (..., actionspace) in x.dtype.
    (If x is bf16 the log-probs are rounded to bf16.)
    """
    hidden = x.shape[-1]
    actionspace = weight.shape[0]
    lead = x.shape[:-1]

    x2d = x.reshape(-1, hidden)
    M = x2d.shape[0]
    itemsize = jnp.dtype(x.dtype).itemsize

    if tm is None:
        # Keep one (hidden, tm) input tile under ~2 MiB (double-buffered ->
        # ~4 MiB) so the kernel fits v5e's 16 MiB / v7x's 32 MiB default
        # scoped VMEM, while staying a multiple of 256 for the MXU / lanes.
        cap = max(256, ((2 << 20) // max(hidden * itemsize, 1)) // 256 * 256)
        tm = min(2048, cap, _round_up(M, 256))
    tm = max(128, _round_up(tm, 128))        # lane alignment (8,128) rule

    M_pad = _round_up(M, tm)
    if M_pad != M:
        x2d = jnp.pad(x2d, ((0, M_pad - M), (0, 0)))   # zero rows -> finite logits

    x_t = x2d.T                              # (hidden, M_pad): rows -> lanes
    b2d = bias.reshape(actionspace, 1)

    cost = pl.CostEstimate(
        flops=2 * M_pad * hidden * actionspace,
        transcendentals=M_pad * actionspace,
        bytes_accessed=(M_pad * hidden + actionspace * hidden
                        + actionspace + actionspace * M_pad) * itemsize,
    )

    out_t = pl.pallas_call(
        _next_action_kernel,
        out_shape=jax.ShapeDtypeStruct((actionspace, M_pad), x.dtype),
        grid_spec=pl.GridSpec(
            grid=(M_pad // tm,),
            in_specs=[
                pl.BlockSpec((hidden, tm), lambda i: (0, i)),
                pl.BlockSpec((actionspace, hidden), lambda i: (0, 0)),
                pl.BlockSpec((actionspace, 1), lambda i: (0, 0)),
            ],
            out_specs=pl.BlockSpec((actionspace, tm), lambda i: (0, i)),
        ),
        compiler_params=pltpu.CompilerParams(
            dimension_semantics=("parallel",)),
        cost_estimate=cost,
    )(x_t, weight, b2d)

    # lane-dense (actionspace, M_pad) -> (..., actionspace)
    return out_t.T[:M].reshape(*lead, actionspace)


def _reference(x, weight, bias):
    logits = jnp.einsum("...h,ah->...a", x, weight) + bias
    return jax.nn.log_softmax(logits, axis=-1)


if __name__ == "__main__":
    # Small shapes consistent with the module: hidden=32 (BERT output size),
    # actionspace=8, batch=2, seq=8.
    batch, seq, hidden, actionspace = 2, 8, 32, 8

    key = jax.random.PRNGKey(0)
    kx, kw, kb = jax.random.split(key, 3)

    x = jax.random.normal(kx, (batch, seq, hidden), dtype=jnp.float32)
    # Deterministic Linear init (PyTorch-style uniform bound 1/sqrt(hidden)).
    bound = 1.0 / (hidden ** 0.5)
    weight = jax.random.uniform(kw, (actionspace, hidden),
                                minval=-bound, maxval=bound, dtype=jnp.float32)
    bias = jax.random.uniform(kb, (actionspace,),
                              minval=-bound, maxval=bound, dtype=jnp.float32)

    out = next_action_prediction(x, weight, bias)
    out = jax.block_until_ready(out)

    ref = _reference(x, weight, bias)
    assert out.shape == (batch, seq, actionspace)
    assert jnp.allclose(out, ref, atol=1e-5, rtol=1e-5), "mismatch vs reference"

    print("KERNEL_OK")
</pallas_src>

<mosaic_0001>
module attributes {stable_mosaic.version = 11 : i64} {
  func.func @_next_action_kernel(%arg0: i32, %arg1: memref<32x256xf32, #tpu.memory_space<vmem>>, %arg2: memref<8x32xf32, #tpu.memory_space<vmem>>, %arg3: memref<8x1xf32, #tpu.memory_space<vmem>>, %arg4: memref<8x256xf32, #tpu.memory_space<vmem>>) attributes {dimension_semantics = [#tpu.dimension_semantics<parallel>], iteration_bounds = array<i64: 1>, scalar_prefetch = 0 : i64, scratch_operands = 0 : i64, tpu.core_type = #tpu.core_type<tc>, window_params = [{transform_indices = @transform_0, window_bounds = array<i64: 32, 256>}, {pipeline_mode = #tpu.pipeline_mode<synchronous>, transform_indices = @transform_1, window_bounds = array<i64: 8, 32>}, {pipeline_mode = #tpu.pipeline_mode<synchronous>, transform_indices = @transform_2, window_bounds = array<i64: 8, 1>}, {transform_indices = @transform_3, window_bounds = array<i64: 8, 256>}]} {
    %c0 = arith.constant 0 : index
    %c0_0 = arith.constant 0 : index
    %0 = vector.load %arg2[%c0, %c0_0] : memref<8x32xf32, #tpu.memory_space<vmem>>, vector<8x32xf32>
    %c0_1 = arith.constant 0 : index
    %c0_2 = arith.constant 0 : index
    %1 = vector.load %arg1[%c0_1, %c0_2] : memref<32x256xf32, #tpu.memory_space<vmem>>, vector<32x256xf32>
    %cst = arith.constant dense<0.000000e+00> : vector<8x256xf32>
    %2 = tpu.matmul %0, %1, %cst {dimension_numbers = #tpu.dot_dimension_numbers<[1], [0], [0], [1], [0, 0, 1, 1], [], []>} : vector<8x32xf32>, vector<32x256xf32>, vector<8x256xf32> -> vector<8x256xf32>
    %c0_3 = arith.constant 0 : index
    %c0_4 = arith.constant 0 : index
    %3 = vector.load %arg3[%c0_3, %c0_4] : memref<8x1xf32, #tpu.memory_space<vmem>>, vector<8x1xf32>
    %4 = vector.broadcast %3 : vector<8x1xf32> to vector<8x256xf32>
    %5 = arith.addf %2, %4 : vector<8x256xf32>
    %cst_5 = arith.constant dense<0xFF800000> : vector<256xf32>
    %6 = vector.multi_reduction <maximumf>, %5, %cst_5 [0] : vector<8x256xf32> to vector<256xf32>
    %7 = vector.shape_cast %6 : vector<256xf32> to vector<1x256xf32>
    %8 = vector.broadcast %7 : vector<1x256xf32> to vector<8x256xf32>
    %9 = arith.subf %5, %8 : vector<8x256xf32>
    %10 = math.exp %9 : vector<8x256xf32>
    %cst_6 = arith.constant dense<0.000000e+00> : vector<256xf32>
    %11 = vector.multi_reduction <add>, %10, %cst_6 [0] : vector<8x256xf32> to vector<256xf32>
    %12 = vector.shape_cast %11 : vector<256xf32> to vector<1x256xf32>
    %13 = math.log %12 : vector<1x256xf32>
    %14 = vector.broadcast %13 : vector<1x256xf32> to vector<8x256xf32>
    %15 = arith.subf %9, %14 : vector<8x256xf32>
    %c0_7 = arith.constant 0 : index
    %c0_8 = arith.constant 0 : index
    %16 = vector.load %arg4[%c0_7, %c0_8] : memref<8x256xf32, #tpu.memory_space<vmem>>, vector<8x256xf32>
    tpu.vector_store %arg4[%c0_7, %c0_8], %15 {strides = array<i32>} : memref<8x256xf32, #tpu.memory_space<vmem>>, vector<8x256xf32>,
    return
  }
  func.func @transform_0(%arg0: i32) -> (i32, i32) {
    %c0_i32 = arith.constant 0 : i32
    %c0_i32_0 = arith.constant 0 : i32
    return %c0_i32, %arg0 : i32, i32
  }
  func.func @transform_1(%arg0: i32) -> (i32, i32) {
    %c0_i32 = arith.constant 0 : i32
    %c0_i32_0 = arith.constant 0 : i32
    %c0_i32_1 = arith.constant 0 : i32
    return %c0_i32, %c0_i32_0 : i32, i32
  }
  func.func @transform_2(%arg0: i32) -> (i32, i32) {
    %c0_i32 = arith.constant 0 : i32
    %c0_i32_0 = arith.constant 0 : i32
    %c0_i32_1 = arith.constant 0 : i32
    return %c0_i32, %c0_i32_0 : i32, i32
  }
  func.func @transform_3(%arg0: i32) -> (i32, i32) {
    %c0_i32 = arith.constant 0 : i32
    %c0_i32_0 = arith.constant 0 : i32
    return %c0_i32, %arg0 : i32, i32
  }
}

</mosaic_0001>

<bundles_post_ra>
// kernel: tpu_custom_call.1
= control target key start
LH: loop header
LB: loop body
LE: loop exit
PB: predicated region body
PF: predicated region fallthrough
CT: control target
= control target key end

     0   :  { %8 = vsyncpa [#allocation3], 0  ;;  %s270_s0 = inlined_call_operand.hbm [shape: f32[32,256], index: 0, kind: input, shape index: {}]   ;;  %s271_s1 = inlined_call_operand.vmem [shape: f32[8,32], index: 1, kind: input, shape index: {}]   ;;  %s272_s2 = inlined_call_operand.vmem [shape: f32[8,1], index: 2, kind: input, shape index: {}]   ;;  %s273_s3 = inlined_call_operand.hbm [shape: f32[8,256], index: 3, kind: output, shape index: {}]  }
   0x1   :  { %9 = vsyncpa [#allocation4], 0  ;;  %s232_s12 = smov [#allocation2]  }
   0x2   :  { %s15_s13 = sshll.u32 %s232_s12, 4  ;;  %s16_s13 = int_to_ptr.vmem [resolvable:$true] %s15_s13 }
   0x3   :  { %s196_s14 = scalar_lea.vmem %s16_s13, 1024  ;;  %p201_p1 = scmp.lt.s32.totalorder %s16_s13, %s16_s13 }
   0x4   :  { %p197_p0 = scmp.ne.s32.totalorder %s16_s13, %s196_s14  ;;  %p202_p2 = scmp.lt.s32.totalorder %s196_s14, %s196_s14 }
   0x6   :  { %p203_p3 = por %p202_p2, %p201_p1 }
   0x8   :  { %p204_p4 = pnand %p203_p3, %p197_p0 }
   0xa   :  { %207 = shalt.err (!%p204_p4)
}
   0xb   :  { %s233_s15 = smov 256   ;;  %s234_s16 = smov 16  }
   0xc   :  { %21 = dma.hbm_to_vmem [thread:$0]  %s270_s0, 1024, %s16_s13, [#allocation3], %s233_s15, %s233_s15, %s234_s16  }
   0xd   :  { %228 = dma.done.wait [#allocation3], 1024  }
   0xe   :  { %229 = vsyncadd [#allocation3], 4294966272  ;;  %v235_v0 = vmov 0.0   ;;  %v236_v1 = vmov 0   ;;  %v37_v2 = vld [vmem:[#allocation2 + $0x38] sm:$0xff]  ;;  %v36_v3 = vld [vmem:[#allocation2 + $0x30] sm:$0xff] }
   0xf   :  { %112 = vmatprep.mubr.f32.mxu0 %v235_v0  ;;  %179 = vset.pattern.permute.xlu0 %v236_v1  ;;  %v35_v4 = vld [vmem:[#allocation2 + $0x28] sm:$0xff]  ;;  %v34_v5 = vld [vmem:[#allocation2 + $0x20] sm:$0xff]  ;;  %v33_v6 = vld [vmem:[#allocation2 + $0x18] sm:$0xff]  ;;  %vm44_vm0 = vcmask 261120  }
  0x10   :  { %72 = vmatprep.subr.mxu0 %v37_v2  ;;  %v32_v7 = vld [vmem:[#allocation2 + $0x10] sm:$0xff]  ;;  %v38_v8 = vld [vmem:[%s272_s2] sm:$0xff]  ;;  %v31_v9 = vld [vmem:[#allocation2 + $0x8] sm:$0xff] }
  0x11   :  { %73 = vmatpush1.msra.mxu0 %v36_v3  ;;  %41 = vperm.xlu0 %179, %v38_v8   ;;  %v30_v10 = vld [vmem:[#allocation2] sm:$0xff] }
  0x12   :  { %74 = vmatprep.subr.mxu0 %v35_v4  ;;  %v29_v11 = vld [vmem:[%s271_s1] sm:$0xff]  ;;  %s237_s1 = smov [#allocation5]  }
  0x13   :  { %75 = vmatpush1.msra.mxu0 %v34_v5  ;;  %s163_s2 = sshll.u32 %s237_s1, 4  ;;  %s164_s2 = int_to_ptr.vmem [resolvable:$true] %s163_s2 }
  0x14   :  { %76 = vmatprep.subr.mxu0 %v33_v6  ;;  %s208_s22 = scalar_lea.vmem %s164_s2, 256  ;;  %p213_p6 = scmp.lt.s32.totalorder %s164_s2, %s164_s2 }
  0x15   :  { %77 = vmatpush1.msra.mxu0 %v32_v7  ;;  %p209_p5 = scmp.ne.s32.totalorder %s164_s2, %s208_s22  ;;  %p214_p7 = scmp.lt.s32.totalorder %s208_s22, %s208_s22 }
  0x16   :  { %78 = vmatprep.subr.mxu0 %v31_v9 }
  0x17   :  { %79 = vmatpush1.msra.mxu0 %v30_v10  ;;  %p215_p8 = por %p214_p7, %p213_p6 }
  0x18   :  { %172 = vmatmul.mubr.msk.f32.vlgmr.msra.gmra.mxu0 %vm44_vm0, %v29_v11 }
  0x19   :  { %p216_p9 = pnand %p215_p8, %p209_p5 }
  0x8c   :  { %v42_v12 = vpop.permute.xlu0 %41 }
  0xd8   :  { %v114_v13 = vpop.f32.mrf.mxu0 }
  0xd9   :  { %v115_v14 = vadd.f32 %v114_v13, %v42_v12 }
  0xda   :  { %v116_v15 = vpop.f32.mrf.mxu0 }
  0xdb   :  { %v119_v16 = vrot.slane %v115_v14, 4  ;;  %v117_v17 = vadd.f32 %v116_v15, %v42_v12 }
  0xdd   :  { %v120_v18 = vmax.f32 %v115_v14, %v119_v16  ;;  %v125_v19 = vrot.slane %v117_v17, 4 }
  0xdf   :  { %v121_v20 = vrot.slane %v120_v18, 2  ;;  %v126_v21 = vmax.f32 %v117_v17, %v125_v19 }
  0xe1   :  { %v122_v22 = vmax.f32 %v120_v18, %v121_v20  ;;  %v127_v23 = vrot.slane %v126_v21, 2 }
  0xe3   :  { %v123_v24 = vrot.slane %v122_v22, 1  ;;  %v128_v25 = vmax.f32 %v126_v21, %v127_v23 }
  0xe5   :  { %v124_v26 = vmax.f32 %v122_v22, %v123_v24  ;;  %v129_v27 = vrot.slane %v128_v25, 1 }
  0xe7   :  { %v131_v28 = vsub.f32 %v115_v14, %v124_v26  ;;  %v130_v29 = vmax.f32 %v128_v25, %v129_v27 }
  0xe9   :  { %v133_v30 = vmul.f32 1.442695, %v131_v28  ;;  %v132_v31 = vsub.f32 %v117_v17, %v130_v29 }
  0xeb   :  { %180 = vpow2.f32 %v133_v30  ;;  %v135_v32 = vmul.f32 1.442695, %v132_v31 }
  0xed   :  { %182 = vpow2.f32 %v135_v32 }
  0xf8   :  { %v181_v33 = vpop.eup %180 }
  0xf9   :  { %v137_v34 = vrot.slane %v181_v33, 4 }
  0xfa   :  { %v183_v35 = vpop.eup %182 }
  0xfb   :  { %v138_v36 = vadd.f32 %v181_v33, %v137_v34  ;;  %v143_v37 = vrot.slane %v183_v35, 4 }
  0xfd   :  { %v139_v38 = vrot.slane %v138_v36, 2  ;;  %v144_v39 = vadd.f32 %v183_v35, %v143_v37 }
  0xff   :  { %v140_v40 = vadd.f32 %v139_v38, %v138_v36  ;;  %v145_v41 = vrot.slane %v144_v39, 2 }
 0x101   :  { %v141_v42 = vrot.slane %v140_v40, 1  ;;  %v146_v43 = vadd.f32 %v145_v41, %v144_v39 }
 0x103   :  { %v142_v44 = vadd.f32 %v141_v42, %v140_v40  ;;  %v147_v45 = vrot.slane %v146_v43, 1 }
 0x105   :  { %v148_v46 = vadd.f32 %v147_v45, %v146_v43  ;;  %184 = vlog2.f32 %v142_v44 }
 0x107   :  { %186 = vlog2.f32 %v148_v46 }
 0x112   :  { %v185_v47 = vpop.eup %184 }
 0x113   :  { %v150_v48 = vmul.f32 0.6931472, %v185_v47 }
 0x114   :  { %v187_v49 = vpop.eup %186 }
 0x115   :  { %v152_v50 = vmul.f32 0.6931472, %v187_v49  ;;  %v153_v51 = vsub.f32 %v131_v28, %v150_v48 }
 0x117   :  { %v154_v52 = vsub.f32 %v132_v31, %v152_v50  ;;  %155 = vst [vmem:[#allocation5] sm:$0xff] %v153_v51 }
 0x119   :  { %156 = vst [vmem:[#allocation5 + $0x8] sm:$0xff] %v154_v52 }
 0x11a   :  { %219 = shalt.err (!%p216_p9)
}
 0x11b   :  { %166 = dma.vmem_to_hbm [thread:$0]  %s164_s2, 256, %s273_s3, [#allocation4]  }
 0x11c   :  { %230 = dma.done.wait [#allocation4], 256  }
 0x11d   :  { %231 = vsyncadd [#allocation4], 4294967040 }
 0x11e   :  { %170 = vsyncpa [#allocation3], 1 }
 0x11f   :  { %171 = vsyncpa [#allocation4], 1 }

</bundles_post_ra>
